<compile_context>
chip_gen: v5e
topology: v5e:2x2
jax: 0.10.0
libtpu: 0.0.40
codegen_flags: <defaults>
</compile_context>

<pallas_src>
import functools

import jax
import jax.numpy as jnp
from jax.experimental import pallas as pl
from jax.experimental.pallas import tpu as pltpu

_LANE = 128
# Per-block VMEM budget. With double-buffered input + output blocks the
# pipeline uses ~4x this, well under the default scoped VMEM on every
# generation (16 MiB v5e, 32 MiB v6e/v7x).
_BLOCK_BUDGET_BYTES = 2 * 1024 * 1024


def _round_up(x, m):
    return (x + m - 1) // m * m


def _largest_divisor_leq(n, cap):
    cap = max(1, min(n, cap))
    for d in range(cap, 0, -1):
        if n % d == 0:
            return d
    return 1


# ----------------------------- fused single-pass -----------------------------
def _fused_kernel(x_ref, w1_ref, w2_ref, o_ref, *, inv_hw):
    # x_ref: (Bt, C, HWp); w1_ref: (C, Cr); w2_ref: (Cr, C)
    x = x_ref[...]
    # global average pool (sum * 1/HW so zero-padded lanes don't bias the mean)
    y = jnp.sum(x.astype(jnp.float32), axis=-1) * inv_hw            # (Bt, C)
    # batched FC: Linear -> ReLU -> Linear -> ReLU -> Sigmoid (no biases)
    h = jnp.maximum(jnp.dot(y, w1_ref[...],
                            preferred_element_type=jnp.float32), 0.0)  # (Bt, Cr)
    z = jnp.maximum(jnp.dot(h, w2_ref[...],
                            preferred_element_type=jnp.float32), 0.0)  # (Bt, C)
    s = jax.nn.sigmoid(z)                                            # (Bt, C)
    o_ref[...] = (x * s[:, :, None]).astype(o_ref.dtype)


# ------------------------ two-pass: pool+FC then scale ------------------------
def _pool_fc_kernel(x_ref, w1_ref, w2_ref, s_ref, acc_ref, *, inv_hw):
    # grid = (batch tiles, HW tiles); HW is the (arbitrary) reduction axis.
    @pl.when(pl.program_id(1) == 0)
    def _():
        acc_ref[...] = jnp.zeros_like(acc_ref)

    acc_ref[...] += jnp.sum(x_ref[...].astype(jnp.float32), axis=-1)  # (Bt, C)

    @pl.when(pl.program_id(1) == pl.num_programs(1) - 1)
    def _():
        y = acc_ref[...] * inv_hw                                     # (Bt, C)
        h = jnp.maximum(jnp.dot(y, w1_ref[...],
                                preferred_element_type=jnp.float32), 0.0)
        z = jnp.maximum(jnp.dot(h, w2_ref[...],
                                preferred_element_type=jnp.float32), 0.0)
        s_ref[...] = jax.nn.sigmoid(z)[:, :, None].astype(s_ref.dtype)


def _scale_kernel(s_ref, x_ref, o_ref):
    # s_ref: (Bt, C, 1); x_ref: (Bt, C, thw)
    o_ref[...] = (x_ref[...] * s_ref[...]).astype(o_ref.dtype)


# --------------------------------- wrapper -----------------------------------
def channelwise_attention(x_nchw, w1, w2, *,
                          block_budget_bytes=_BLOCK_BUDGET_BYTES):
    """x_nchw: (B, C, H, W)
       w1: (C, C//r)  == PyTorch fc[0].weight.T
       w2: (C//r, C)  == PyTorch fc[2].weight.T
    """
    B, C, H, W = x_nchw.shape
    HW = H * W
    Cr = w1.shape[1]
    dtype = x_nchw.dtype
    itemsize = jnp.dtype(dtype).itemsize

    # pad spatial dim to a multiple of 128 -> lane-dense, unmasked stores
    HWp = _round_up(HW, _LANE)
    x = x_nchw.reshape(B, C, HW)
    if HWp != HW:
        x = jnp.pad(x, ((0, 0), (0, 0), (0, HWp - HW)))
    inv_hw = 1.0 / float(HW)

    sample_bytes = C * HWp * itemsize

    if sample_bytes <= block_budget_bytes:
        # ---- fused single-pass: Bt samples per grid step ----
        bt = _largest_divisor_leq(B, block_budget_bytes // sample_bytes)
        out = pl.pallas_call(
            functools.partial(_fused_kernel, inv_hw=inv_hw),
            out_shape=jax.ShapeDtypeStruct((B, C, HWp), dtype),
            grid_spec=pltpu.PrefetchScalarGridSpec(
                num_scalar_prefetch=0,
                grid=(B // bt,),
                in_specs=[
                    pl.BlockSpec((bt, C, HWp), lambda b: (b, 0, 0)),
                    pl.BlockSpec((C, Cr), lambda b: (0, 0)),
                    pl.BlockSpec((Cr, C), lambda b: (0, 0)),
                ],
                out_specs=pl.BlockSpec((bt, C, HWp), lambda b: (b, 0, 0)),
            ),
            compiler_params=pltpu.CompilerParams(
                dimension_semantics=("parallel",)),
        )(x, w1, w2)
    else:
        # ---- two-pass: spatially tiled reduce+FC, then tiled scale ----
        lanes_total = HWp // _LANE
        lanes_per_tile = _largest_divisor_leq(
            lanes_total, max(1, block_budget_bytes // (C * _LANE * itemsize)))
        thw = lanes_per_tile * _LANE
        n_hw = HWp // thw
        bt = 1

        s = pl.pallas_call(
            functools.partial(_pool_fc_kernel, inv_hw=inv_hw),
            out_shape=jax.ShapeDtypeStruct((B, C, 1), jnp.float32),
            grid_spec=pltpu.PrefetchScalarGridSpec(
                num_scalar_prefetch=0,
                grid=(B // bt, n_hw),
                in_specs=[
                    pl.BlockSpec((bt, C, thw), lambda b, k: (b, 0, k)),
                    pl.BlockSpec((C, Cr), lambda b, k: (0, 0)),
                    pl.BlockSpec((Cr, C), lambda b, k: (0, 0)),
                ],
                out_specs=pl.BlockSpec((bt, C, 1), lambda b, k: (b, 0, 0)),
                scratch_shapes=[pltpu.VMEM((bt, C), jnp.float32)],
            ),
            compiler_params=pltpu.CompilerParams(
                dimension_semantics=("parallel", "arbitrary")),
        )(x, w1, w2)

        out = pl.pallas_call(
            _scale_kernel,
            out_shape=jax.ShapeDtypeStruct((B, C, HWp), dtype),
            grid_spec=pltpu.PrefetchScalarGridSpec(
                num_scalar_prefetch=0,
                grid=(B // bt, n_hw),
                in_specs=[
                    pl.BlockSpec((bt, C, 1), lambda b, k: (b, 0, 0)),
                    pl.BlockSpec((bt, C, thw), lambda b, k: (b, 0, k)),
                ],
                out_specs=pl.BlockSpec((bt, C, thw), lambda b, k: (b, 0, k)),
            ),
            compiler_params=pltpu.CompilerParams(
                dimension_semantics=("parallel", "parallel")),
        )(s, x)

    if HWp != HW:
        out = out[:, :, :HW]
    return out.reshape(B, C, H, W)


def reference(x_nchw, w1, w2):
    # pure-JAX reference of the PyTorch forward
    y = jnp.mean(x_nchw, axis=(2, 3))              # (B, C)
    h = jnp.maximum(y @ w1, 0.0)
    z = jnp.maximum(h @ w2, 0.0)
    s = jax.nn.sigmoid(z)                          # (B, C)
    return x_nchw * s[:, :, None, None]


if __name__ == "__main__":
    # in_channels=32, reduction=16 -> hidden = 2
    B, C, H, W = 2, 32, 16, 16
    reduction = 16
    Cr = C // reduction

    key = jax.random.PRNGKey(0)
    kx, k1, k2 = jax.random.split(key, 3)

    x = jax.random.normal(kx, (B, C, H, W), dtype=jnp.float32)
    # deterministic "Linear" weights (stored pre-transposed for y @ W)
    w1 = jax.random.normal(k1, (C, Cr), dtype=jnp.float32) * (1.0 / jnp.sqrt(C))
    w2 = jax.random.normal(k2, (Cr, C), dtype=jnp.float32) * (1.0 / jnp.sqrt(Cr))

    ref = reference(x, w1, w2)

    # Fused single-pass path (whole batch collapses to one grid step here).
    out = jax.block_until_ready(channelwise_attention(x, w1, w2))
    assert out.shape == (B, C, H, W)
    assert jnp.allclose(out, ref, atol=1e-5, rtol=1e-5)

    # Also exercise the two-pass (spatially tiled) path by forcing a tiny
    # per-block VMEM budget, as used when C*H*W no longer fits VMEM.
    out2 = jax.block_until_ready(
        channelwise_attention(x, w1, w2, block_budget_bytes=16 * 1024))
    assert jnp.allclose(out2, ref, atol=1e-5, rtol=1e-5)

    print("KERNEL_OK")
</pallas_src>

<mosaic_0001>
module attributes {stable_mosaic.version = 11 : i64} {
  func.func @_fused_kernel(%arg0: i32, %arg1: memref<2x32x256xf32, #tpu.memory_space<vmem>>, %arg2: memref<32x2xf32, #tpu.memory_space<vmem>>, %arg3: memref<2x32xf32, #tpu.memory_space<vmem>>, %arg4: memref<2x32x256xf32, #tpu.memory_space<vmem>>) attributes {dimension_semantics = [#tpu.dimension_semantics<parallel>], iteration_bounds = array<i64: 1>, scalar_prefetch = 0 : i64, scratch_operands = 0 : i64, tpu.core_type = #tpu.core_type<tc>, window_params = [{transform_indices = @transform_0, window_bounds = array<i64: 2, 32, 256>}, {pipeline_mode = #tpu.pipeline_mode<synchronous>, transform_indices = @transform_1, window_bounds = array<i64: 32, 2>}, {pipeline_mode = #tpu.pipeline_mode<synchronous>, transform_indices = @transform_2, window_bounds = array<i64: 2, 32>}, {transform_indices = @transform_3, window_bounds = array<i64: 2, 32, 256>}]} {
    %c0 = arith.constant 0 : index
    %c0_0 = arith.constant 0 : index
    %c0_1 = arith.constant 0 : index
    %0 = vector.load %arg1[%c0, %c0_0, %c0_1] : memref<2x32x256xf32, #tpu.memory_space<vmem>>, vector<2x32x256xf32>
    %cst = arith.constant dense<0.000000e+00> : vector<2x32xf32>
    %1 = vector.multi_reduction <add>, %0, %cst [2] : vector<2x32x256xf32> to vector<2x32xf32>
    %cst_2 = arith.constant 3.906250e-03 : f32
    %2 = vector.broadcast %cst_2 : f32 to vector<2x32xf32>
    %3 = arith.mulf %1, %2 : vector<2x32xf32>
    %c0_3 = arith.constant 0 : index
    %c0_4 = arith.constant 0 : index
    %4 = vector.load %arg2[%c0_3, %c0_4] : memref<32x2xf32, #tpu.memory_space<vmem>>, vector<32x2xf32>
    %cst_5 = arith.constant dense<0.000000e+00> : vector<2x2xf32>
    %5 = tpu.matmul %3, %4, %cst_5 {dimension_numbers = #tpu.dot_dimension_numbers<[1], [0], [0], [1], [0, 0, 1, 1], [], []>} : vector<2x32xf32>, vector<32x2xf32>, vector<2x2xf32> -> vector<2x2xf32>
    %cst_6 = arith.constant 0.000000e+00 : f32
    %6 = vector.broadcast %cst_6 : f32 to vector<2x2xf32>
    %7 = arith.maximumf %5, %6 : vector<2x2xf32>
    %c0_7 = arith.constant 0 : index
    %c0_8 = arith.constant 0 : index
    %8 = vector.load %arg3[%c0_7, %c0_8] : memref<2x32xf32, #tpu.memory_space<vmem>>, vector<2x32xf32>
    %cst_9 = arith.constant dense<0.000000e+00> : vector<2x32xf32>
    %9 = tpu.matmul %7, %8, %cst_9 {dimension_numbers = #tpu.dot_dimension_numbers<[1], [0], [0], [1], [0, 0, 1, 1], [], []>} : vector<2x2xf32>, vector<2x32xf32>, vector<2x32xf32> -> vector<2x32xf32>
    %cst_10 = arith.constant 0.000000e+00 : f32
    %10 = vector.broadcast %cst_10 : f32 to vector<2x32xf32>
    %11 = arith.maximumf %9, %10 : vector<2x32xf32>
    %12 = arith.negf %11 : vector<2x32xf32>
    %13 = math.exp %12 : vector<2x32xf32>
    %cst_11 = arith.constant 1.000000e+00 : f32
    %14 = vector.broadcast %cst_11 : f32 to vector<2x32xf32>
    %15 = arith.addf %14, %13 : vector<2x32xf32>
    %16 = arith.divf %14, %15 : vector<2x32xf32>
    %17 = vector.shape_cast %16 : vector<2x32xf32> to vector<2x32x1xf32>
    %18 = vector.broadcast %17 : vector<2x32x1xf32> to vector<2x32x256xf32>
    %19 = arith.mulf %0, %18 : vector<2x32x256xf32>
    %c0_12 = arith.constant 0 : index
    %c0_13 = arith.constant 0 : index
    %c0_14 = arith.constant 0 : index
    %20 = vector.load %arg4[%c0_12, %c0_13, %c0_14] : memref<2x32x256xf32, #tpu.memory_space<vmem>>, vector<2x32x256xf32>
    tpu.vector_store %arg4[%c0_12, %c0_13, %c0_14], %19 {strides = array<i32>} : memref<2x32x256xf32, #tpu.memory_space<vmem>>, vector<2x32x256xf32>,
    return
  }
  func.func @transform_0(%arg0: i32) -> (i32, i32, i32) {
    %c0_i32 = arith.constant 0 : i32
    %c0_i32_0 = arith.constant 0 : i32
    %c0_i32_1 = arith.constant 0 : i32
    return %arg0, %c0_i32, %c0_i32_0 : i32, i32, i32
  }
  func.func @transform_1(%arg0: i32) -> (i32, i32) {
    %c0_i32 = arith.constant 0 : i32
    %c0_i32_0 = arith.constant 0 : i32
    %c0_i32_1 = arith.constant 0 : i32
    return %c0_i32, %c0_i32_0 : i32, i32
  }
  func.func @transform_2(%arg0: i32) -> (i32, i32) {
    %c0_i32 = arith.constant 0 : i32
    %c0_i32_0 = arith.constant 0 : i32
    %c0_i32_1 = arith.constant 0 : i32
    return %c0_i32, %c0_i32_0 : i32, i32
  }
  func.func @transform_3(%arg0: i32) -> (i32, i32, i32) {
    %c0_i32 = arith.constant 0 : i32
    %c0_i32_0 = arith.constant 0 : i32
    %c0_i32_1 = arith.constant 0 : i32
    return %arg0, %c0_i32, %c0_i32_0 : i32, i32, i32
  }
}

</mosaic_0001>

<bundles_post_ra>
// kernel: tpu_custom_call.1
= control target key start
LH: loop header
LB: loop body
LE: loop exit
PB: predicated region body
PF: predicated region fallthrough
CT: control target
= control target key end

     0   :  { %8 = vsyncpa [#allocation3], 0  ;;  %s477_s0 = inlined_call_operand.hbm [shape: f32[2,32,256], index: 0, kind: input, shape index: {}]   ;;  %s478_s1 = inlined_call_operand.vmem [shape: f32[32,2], index: 1, kind: input, shape index: {}]   ;;  %s479_s2 = inlined_call_operand.vmem [shape: f32[2,32], index: 2, kind: input, shape index: {}]   ;;  %s480_s3 = inlined_call_operand.hbm [shape: f32[2,32,256], index: 3, kind: output, shape index: {}]  }
   0x1   :  { %9 = vsyncpa [#allocation4], 0  ;;  %s14_s14 = sshll.u32 %s477_s0, 4  ;;  %s362_s15 = smov [#allocation2]   ;;  %s15_s14 = int_to_ptr.hbm [resolvable:$true] %s14_s14 }
   0x2   :  { %s16_s16 = sshll.u32 %s362_s15, 4  ;;  %s363_s17 = smov 256   ;;  %s17_s16 = int_to_ptr.vmem [resolvable:$true] %s16_s16 }
   0x3   :  { %s364_s18 = smov 16  }
   0x4   :  { %22 = dma.hbm_to_vmem [thread:$0]  %s15_s14, 2048, %s17_s16, [#allocation3], %s363_s17, %s363_s17, %s364_s18  }
   0x5   :  { %358 = dma.done.wait [#allocation3], 2048  }
   0x6   :  { %359 = vsyncadd [#allocation3], 4294965248  ;;  %v392_v0 = vld [vmem:[#allocation2 + $0x40] sm:$0xff]  ;;  %v394_v1 = vld [vmem:[#allocation2 + $0x48] sm:$0xff]  ;;  %v91_v31 = vlaneseq  ;;  %vm96_vm0 = vcmask 130112   ;;  %vm100_vm1 = vcmask 195712  }
   0x7   :  { %v396_v2 = vld [vmem:[#allocation2] sm:$0xff]  ;;  %v59_v3 = vadd.f32 %v394_v1, %v392_v0  ;;  %v400_v4 = vld [vmem:[#allocation2 + $0x8] sm:$0xff]  ;;  %v410_v9 = vld [vmem:[#allocation2 + $0x50] sm:$0xff]  ;;  %vm104_vm2 = vcmask 261312   ;;  %vm113_vm3 = vcmask 1041409   ;;  %vm115_vm4 = vcmask 261120  }
   0x8   :  { %v402_v5 = vld [vmem:[#allocation2 + $0x20] sm:$0xff]  ;;  %v404_v6 = vld [vmem:[#allocation2 + $0x28] sm:$0xff]  ;;  %v47_v7 = vadd.f32 %v400_v4, %v396_v2  ;;  %v412_v10 = vld [vmem:[#allocation2 + $0x58] sm:$0xff]  ;;  %v92_v32 = vand.u32 127, %v91_v31  ;;  %vm144_vm5 = vcmask 1041408   ;;  %vm140_vm6 = vcmask 15360  }
   0x9   :  { %v53_v8 = vadd.f32 %v404_v6, %v402_v5  ;;  %60 = vadd.xlane.f32.xlu1 %v59_v3  ;;  %v414_v11 = vld [vmem:[#allocation2 + $0x10] sm:$0xff]  ;;  %v416_v12 = vld [vmem:[#allocation2 + $0x18] sm:$0xff]  ;;  %v418_v13 = vld [vmem:[#allocation2 + $0x60] sm:$0xff]  ;;  %v62_v15 = vadd.f32 %v412_v10, %v410_v9  ;;  %s276_s30 = sshll.u32 %s480_s3, 4  ;;  %s277_s30 = int_to_ptr.hbm [resolvable:$true] %s276_s30 }
   0xa   :  { %48 = vadd.xlane.f32.xlu0 %v47_v7  ;;  %v420_v14 = vld [vmem:[#allocation2 + $0x68] sm:$0xff]  ;;  %v50_v16 = vadd.f32 %v416_v12, %v414_v11  ;;  %v428_v18 = vld [vmem:[#allocation2 + $0x70] sm:$0xff]  ;;  %v430_v19 = vld [vmem:[#allocation2 + $0x78] sm:$0xff]  ;;  %v94_v34 = vadd.s32 4294967288, %v92_v32  ;;  %v98_v43 = vadd.s32 4294967280, %v92_v32  ;;  %v102_v47 = vadd.s32 4294967272, %v92_v32 }
   0xb   :  { %54 = vadd.xlane.f32.xlu2 %v53_v8  ;;  %v65_v17 = vadd.f32 %v420_v14, %v418_v13  ;;  %v432_v20 = vld [vmem:[#allocation2 + $0x30] sm:$0xff]  ;;  %v434_v21 = vld [vmem:[#allocation2 + $0x38] sm:$0xff]  ;;  %v68_v22 = vadd.f32 %v430_v19, %v428_v18  ;;  %v80_v26 = vld [vmem:[%s478_s1 + $0x8] sm:$0xff] }
   0xc   :  { %v56_v23 = vadd.f32 %v434_v21, %v432_v20  ;;  %v82_v24 = vld [vmem:[%s478_s1 + $0x18] sm:$0xff]  ;;  %v81_v25 = vld [vmem:[%s478_s1 + $0x10] sm:$0xff]  ;;  %v79_v27 = vld [vmem:[%s478_s1] sm:$0xff] }
   0xd   :  { %130 = vmatpush.msra.mxu0 %v82_v24  ;;  %v139_v3 = vld [vmem:[%s479_s2] sm:$0x3]  ;;  %s365_s2 = smov [#allocation5]  }
   0xe   :  { %290 = vmatpush.msk.msra.mxu1 %vm144_vm5, %v139_v3  ;;  %s274_s27 = sshll.u32 %s365_s2, 4  ;;  %s275_s27 = int_to_ptr.vmem [resolvable:$true] %s274_s27 }
   0xf   :  { %131 = vmatpush.msra.mxu0 %v81_v25 }
  0x11   :  { %63 = vadd.xlane.f32.xlu1 %v62_v15  ;;  %132 = vmatpush.msra.mxu0 %v80_v26  ;;  %v190_v15 = vshrl.u32 %v91_v31, 7 }
  0x12   :  { %51 = vadd.xlane.f32.xlu0 %v50_v16 }
  0x13   :  { %66 = vadd.xlane.f32.xlu2 %v65_v17  ;;  %133 = vmatpush.msra.mxu0 %v79_v27  ;;  %v203_v16 = vadd.s32 16, %v190_v15  ;;  %v197_v17 = vadd.s32 8, %v190_v15 }
  0x14   :  { %297 = vset.pattern.permute.xlu2 %v190_v15 }
  0x15   :  { %299 = vset.pattern.permute.xlu1 %v203_v16  ;;  %298 = vset.pattern.permute.xlu0 %v197_v17 }
  0x19   :  { %69 = vadd.xlane.f32.xlu1 %v68_v22 }
  0x1a   :  { %57 = vadd.xlane.f32.xlu0 %v56_v23 }
  0x7c   :  { %v61_v28 = vpop.xlane.xlu1 %60 }
  0x7d   :  { %v49_v29 = vpop.xlane.xlu0 %48  ;;  %v75_v39 = vmul.f32 0.00390625, %v61_v28 }
  0x7e   :  { %v55_v30 = vpop.xlane.xlu2 %54  ;;  %v71_v40 = vmul.f32 0.00390625, %v49_v29 }
  0x7f   :  { %v106_v45 = vperm.slane %v75_v39, %v92_v32  ;;  %v73_v46 = vmul.f32 0.00390625, %v55_v30 }
  0x80   :  { %v93_v48 = vperm.slane %v71_v40, %v92_v32 }
  0x81   :  { %v99_v56 = vperm.slane %v73_v46, %v98_v43 }
  0x84   :  { %v64_v33 = vpop.xlane.xlu1 %63 }
  0x85   :  { %v76_v35 = vmul.f32 0.00390625, %v64_v33  ;;  %v52_v36 = vpop.xlane.xlu0 %51 }
  0x86   :  { %v67_v37 = vpop.xlane.xlu2 %66  ;;  %v72_v38 = vmul.f32 0.00390625, %v52_v36 }
  0x87   :  { %v77_v41 = vmul.f32 0.00390625, %v67_v37  ;;  %v107_v42 = vperm.slane %v76_v35, %v94_v34 }
  0x88   :  { %v95_v44 = vperm.slane %v72_v38, %v94_v34  ;;  %v209_v38 = vadd.s32 24, %v190_v15 }
  0x89   :  { %v109_v49 = vperm.slane %v77_v41, %v98_v43  ;;  %v108_v51 = vsel %vm96_vm0, %v107_v42, %v106_v45 }
  0x8a   :  { %v97_v54 = vsel %vm96_vm0, %v95_v44, %v93_v48 }
  0x8b   :  { %v110_v59 = vsel %vm100_vm1, %v109_v49, %v108_v51  ;;  %v101_v60 = vsel %vm100_vm1, %v99_v56, %v97_v54 }
  0x8c   :  { %v70_v50 = vpop.xlane.xlu1 %69 }
  0x8d   :  { %v78_v52 = vmul.f32 0.00390625, %v70_v50  ;;  %v58_v53 = vpop.xlane.xlu0 %57 }
  0x8e   :  { %v74_v55 = vmul.f32 0.00390625, %v58_v53 }
  0x8f   :  { %v111_v57 = vperm.slane %v78_v52, %v102_v47 }
  0x90   :  { %v103_v58 = vperm.slane %v74_v55, %v102_v47 }
  0x91   :  { %v112_v61 = vsel %vm104_vm2, %v111_v57, %v110_v59 }
  0x92   :  { %v105_v62 = vsel %vm104_vm2, %v103_v58, %v101_v60 }
  0x93   :  { %v114_v63 = vsel %vm113_vm3, %v112_v61, %v105_v62 }
  0x94   :  { %289 = vmatmul.msk.f32.vlgmr.msra.gmra.mxu0 %vm115_vm4, %v114_v63 }
 0x111   :  { %v135_v7 = vpop.f32.mrf.mxu0 }
 0x112   :  { %v138_v8 = vmax.f32 %v135_v7, 0.0 }
 0x114   :  { %291 = vmatmul.msk.f32.vlgmr.msra.gmra.mxu1 %vm140_vm6, %v138_v8 }
 0x191   :  { %v165_v22 = vpop.f32.mrf.mxu1 }
 0x192   :  { %v168_v23 = vmax.f32 %v165_v22, 0.0 }
 0x194   :  { %v292_v24 = vmul.f32 -1.442695, %v168_v23 }
 0x196   :  { %306 = vpow2.f32 %v292_v24 }
 0x19c   :  { %v307_v25 = vpop.eup %306 }
 0x19d   :  { %v172_v26 = vadd.f32 1.0, %v307_v25 }
 0x19f   :  { %308 = vrcp.f32 %v172_v26  ;;  %v184_v30 = vand.u32 2147483648, %v172_v26  ;;  %v182_v33 = vand.u32 2147483647, %v172_v26  ;;  %vm178_vm8 = vweird.f32 %v172_v26 }
 0x1a1   :  { %v185_v34 = vor.u32 1.1754944e-38, %v184_v30  ;;  %vm183_vm10 = vcmp.eq.f32.partialorder %v182_v33, 8.507059e+37 }
 0x1a5   :  { %v309_v27 = vpop.eup %308 }
 0x1a6   :  { %v174_v28 = vmul.f32 %v309_v27, %v172_v26  ;;  %vm179_vm7 = vweird.f32 %v309_v27 }
 0x1a7   :  { %vm180_vm9 = vmor %vm178_vm8, %vm179_vm7 }
 0x1a8   :  { %v175_v29 = vsub.f32 1.0, %v174_v28 }
 0x1aa   :  { %v176_v32 = vmul.f32 %v309_v27, %v175_v29 }
 0x1ac   :  { %v177_v31 = vadd.f32 %v309_v27, %v176_v32 }
 0x1ae   :  { %v181_v35 = vsel %vm180_vm9, %v309_v27, %v177_v31 }
 0x1af   :  { %v186_v36 = vsel %vm183_vm10, %v185_v34, %v181_v35 }
 0x1b0   :  { %v188_v37 = vperm.slane %v186_v36, 0  ;;  %v213_v39 = vperm.slane %v186_v36, 1 }
 0x1b2   :  { %205 = vperm.xlu1 %299, %v188_v37   ;;  %199 = vperm.xlu0 %298, %v188_v37  }
 0x1b3   :  { %193 = vperm.xlu2 %297, %v188_v37  }
 0x1ba   :  { %302 = vset.pattern.permute.xlu1 %v197_v17  ;;  %305 = vset.pattern.permute.xlu0 %v209_v38 }
 0x1bb   :  { %300 = vset.pattern.permute.xlu2 %v209_v38 }
 0x1c2   :  { %224 = vperm.xlu1 %302, %v213_v39  }
 0x1c3   :  { %211 = vperm.xlu2 %300, %v188_v37  }
 0x1ca   :  { %304 = vset.pattern.permute.xlu1 %v209_v38 }
 0x1cb   :  { %301 = vset.pattern.permute.xlu2 %v190_v15 }
 0x1d2   :  { %236 = vperm.xlu1 %304, %v213_v39  }
 0x1d3   :  { %218 = vperm.xlu2 %301, %v213_v39  }
 0x1db   :  { %303 = vset.pattern.permute.xlu2 %v203_v16 }
 0x1e3   :  { %230 = vperm.xlu2 %303, %v213_v39  }
 0x20d   :  { %v194_v40 = vpop.permute.xlu2 %193 }
 0x20e   :  { %v238_v41 = vmul.f32 %v194_v40, %v396_v2  ;;  %v239_v42 = vmul.f32 %v194_v40, %v400_v4 }
 0x210   :  { %254 = vst [vmem:[#allocation5] sm:$0xff] %v238_v41 }
 0x211   :  { %255 = vst [vmem:[#allocation5 + $0x8] sm:$0xff] %v239_v42 }
 0x21d   :  { %v212_v43 = vpop.permute.xlu2 %211 }
 0x21e   :  { %v244_v44 = vmul.f32 %v212_v43, %v432_v20  ;;  %v245_v45 = vmul.f32 %v212_v43, %v434_v21 }
 0x220   :  { %260 = vst [vmem:[#allocation5 + $0x30] sm:$0xff] %v244_v44 }
 0x221   :  { %261 = vst [vmem:[#allocation5 + $0x38] sm:$0xff] %v245_v45 }
 0x224   :  { %v206_v46 = vpop.permute.xlu1 %205  ;;  %v200_v47 = vpop.permute.xlu0 %199 }
 0x225   :  { %v242_v48 = vmul.f32 %v206_v46, %v402_v5  ;;  %v243_v49 = vmul.f32 %v206_v46, %v404_v6  ;;  %v240_v50 = vmul.f32 %v200_v47, %v414_v11  ;;  %v241_v2 = vmul.f32 %v200_v47, %v416_v12 }
 0x227   :  { %258 = vst [vmem:[#allocation5 + $0x20] sm:$0xff] %v242_v48 }
 0x228   :  { %259 = vst [vmem:[#allocation5 + $0x28] sm:$0xff] %v243_v49 }
 0x229   :  { %256 = vst [vmem:[#allocation5 + $0x10] sm:$0xff] %v240_v50 }
 0x22a   :  { %257 = vst [vmem:[#allocation5 + $0x18] sm:$0xff] %v241_v2 }
 0x22d   :  { %v219_v4 = vpop.permute.xlu2 %218 }
 0x22e   :  { %v246_v20 = vmul.f32 %v219_v4, %v392_v0  ;;  %v247_v21 = vmul.f32 %v219_v4, %v394_v1 }
 0x230   :  { %262 = vst [vmem:[#allocation5 + $0x40] sm:$0xff] %v246_v20 }
 0x231   :  { %263 = vst [vmem:[#allocation5 + $0x48] sm:$0xff] %v247_v21 }
 0x234   :  { %v225_v51 = vpop.permute.xlu1 %224 }
 0x235   :  { %v248_v5 = vmul.f32 %v225_v51, %v410_v9  ;;  %v249_v6 = vmul.f32 %v225_v51, %v412_v10 }
 0x237   :  { %264 = vst [vmem:[#allocation5 + $0x50] sm:$0xff] %v248_v5 }
 0x238   :  { %265 = vst [vmem:[#allocation5 + $0x58] sm:$0xff] %v249_v6 }
 0x23d   :  { %v231_v11 = vpop.permute.xlu2 %230 }
 0x23e   :  { %v250_v12 = vmul.f32 %v231_v11, %v418_v13  ;;  %v251_v52 = vmul.f32 %v231_v11, %v420_v14 }
 0x240   :  { %266 = vst [vmem:[#allocation5 + $0x60] sm:$0xff] %v250_v12 }
 0x241   :  { %267 = vst [vmem:[#allocation5 + $0x68] sm:$0xff] %v251_v52 }
 0x244   :  { %v237_v0 = vpop.permute.xlu1 %236 }
 0x245   :  { %v252_v1 = vmul.f32 %v237_v0, %v428_v18  ;;  %v253_v9 = vmul.f32 %v237_v0, %v430_v19 }
 0x247   :  { %268 = vst [vmem:[#allocation5 + $0x70] sm:$0xff] %v252_v1 }
 0x248   :  { %269 = vst [vmem:[#allocation5 + $0x78] sm:$0xff] %v253_v9 }
 0x249   :  { %282 = dma.vmem_to_hbm [thread:$0]  %s275_s27, 2048, %s277_s30, [#allocation4], %s363_s17, %s363_s17, %s364_s18  }
 0x24a   :  { %360 = dma.done.wait [#allocation4], 2048  }
 0x24b   :  { %361 = vsyncadd [#allocation4], 4294965248 }
 0x24c   :  { %287 = vsyncpa [#allocation3], 1 }
 0x24d   :  { %288 = vsyncpa [#allocation4], 1 }

</bundles_post_ra>
